<compile_context>
chip_gen: v5e
topology: v5e:2x2
jax: 0.10.0
libtpu: 0.0.40
codegen_flags: <defaults>
</compile_context>

<pallas_src>
import functools
import math

import jax
import jax.numpy as jnp
from jax.experimental import pallas as pl
from jax.experimental.pallas import tpu as pltpu


# ------------------------------- kernel -------------------------------------

def ffn_kernel(x_ref, w1_ref, b1_ref, w2_ref, b2_ref, o_ref, acc_ref):
    """Grid = (row tiles, hidden tiles).  Accumulate over hidden tiles."""
    f = pl.program_id(1)

    @pl.when(f == 0)
    def _init():
        acc_ref[...] = jnp.zeros_like(acc_ref)

    # (tm, d_model) @ (d_model, tf) -> f32
    h = jnp.dot(x_ref[...], w1_ref[...], preferred_element_type=jnp.float32)
    # bias + ReLU, then cast to the W2 operand dtype (halves the intermediate
    # for bf16 weights and feeds the MXU its native dtype).
    h = jnp.maximum(h + b1_ref[...], 0.0).astype(w2_ref.dtype)
    # (tm, tf) @ (tf, d_out) accumulated in f32 scratch.
    acc_ref[...] += jnp.dot(h, w2_ref[...], preferred_element_type=jnp.float32)

    @pl.when(f == pl.num_programs(1) - 1)
    def _finalize():
        o_ref[...] = (acc_ref[...] + b2_ref[...]).astype(o_ref.dtype)


# ------------------------------- helpers -------------------------------------

def _round_up(n, m):
    return ((n + m - 1) // m) * m


def _default_vmem_cap():
    """~80% of per-core VMEM; conservative 48 MiB fallback (v7x-safe)."""
    try:
        info = pltpu.get_tpu_info()
        cap = getattr(info, "vmem_capacity_bytes", None)
        if cap:
            return int(cap * 0.8)
    except Exception:
        pass
    return 48 << 20


def _budget_bytes(tm, tf, d_model, d_out, act_bytes, w_bytes):
    x_t = 2 * tm * d_model * act_bytes            # double-buffered activation tile
    o_t = 2 * tm * d_out * act_bytes              # double-buffered output tile
    acc = tm * d_out * 4                          # f32 accumulator scratch
    wts = 2 * (d_model * tf + tf * d_out + tf + d_out) * w_bytes  # weight tiles
    h = tm * tf * (4 + w_bytes)                   # f32 intermediate + cast copy
    return x_t + o_t + acc + wts + h


def _pick_tiles(M, d_model, d_ff, d_out, act_bytes, w_bytes, cap, block_m, block_f):
    sub = 16 if act_bytes == 2 else 8             # bf16 needs (16,128) min tile
    tm = max(sub, min(_round_up(block_m, sub), _round_up(M, sub)))
    tf = min(d_ff, block_f)

    def fits(tm_, tf_):
        return _budget_bytes(tm_, tf_, d_model, d_out, act_bytes, w_bytes) <= cap

    # Weights dominate: shrink the hidden tile first, then rows, then hidden again.
    while not fits(tm, tf) and tf > 512 and tf % 2 == 0:
        tf //= 2
    while not fits(tm, tf) and tm > sub:
        tm = max(sub, _round_up(tm // 2, sub))
    while not fits(tm, tf) and tf > 128 and tf % 2 == 0:
        tf //= 2
    return tm, tf


# ------------------------------- wrapper -------------------------------------

def positionwise_feed_forward(x, w1, b1, w2, b2, *, block_m=512, block_f=2048,
                              vmem_cap_bytes=None):
    """y = relu(x @ w1 + b1) @ w2 + b2, tiled over rows and the hidden dim."""
    d_model, d_ff = w1.shape
    d_out = w2.shape[1]
    orig_lead = x.shape[:-1]
    x2d = x.reshape(-1, d_model)
    M = x2d.shape[0]

    act_bytes = x2d.dtype.itemsize
    w_bytes = w1.dtype.itemsize
    cap = int(vmem_cap_bytes) if vmem_cap_bytes is not None else _default_vmem_cap()

    tm, tf = _pick_tiles(M, d_model, d_ff, d_out, act_bytes, w_bytes,
                         cap, block_m, block_f)

    # Zero-pad the hidden dim of the weights if tf does not divide d_ff.
    # (relu(x@0 + 0) == 0 and 0 @ 0 == 0, so padded hidden units contribute 0.)
    F = d_ff
    b1v = b1.reshape(1, d_ff)
    if F % tf != 0:
        F_pad = _round_up(F, tf)
        w1 = jnp.pad(w1, ((0, 0), (0, F_pad - F)))
        b1v = jnp.pad(b1v, ((0, 0), (0, F_pad - F)))
        w2 = jnp.pad(w2, ((0, F_pad - F), (0, 0)))
        F = F_pad
    b2v = b2.reshape(1, d_out)

    grid = (pl.cdiv(M, tm), F // tf)

    flops = 2 * M * F * (d_model + d_out)
    bytes_accessed = (x2d.size * act_bytes + (w1.size + w2.size + F + d_out) * w_bytes
                      + M * d_out * act_bytes)
    cost = pl.CostEstimate(flops=int(flops), transcendentals=0,
                           bytes_accessed=int(bytes_accessed))

    budget = _budget_bytes(tm, tf, d_model, d_out, act_bytes, w_bytes)
    vmem_limit = int(min(max(int(1.5 * budget), 32 << 20), cap))

    out2d = pl.pallas_call(
        ffn_kernel,
        out_shape=jax.ShapeDtypeStruct((M, d_out), x2d.dtype),
        grid=grid,
        in_specs=[
            pl.BlockSpec((tm, d_model), lambda i, f: (i, 0)),   # activation tile
            pl.BlockSpec((d_model, tf), lambda i, f: (0, f)),   # W1 column slab
            pl.BlockSpec((1, tf), lambda i, f: (0, f)),         # b1 slice
            pl.BlockSpec((tf, d_out), lambda i, f: (f, 0)),     # W2 row slab
            pl.BlockSpec((1, d_out), lambda i, f: (0, 0)),      # b2 (resident)
        ],
        out_specs=pl.BlockSpec((tm, d_out), lambda i, f: (i, 0)),
        scratch_shapes=[pltpu.VMEM((tm, d_out), jnp.float32)],
        compiler_params=pltpu.CompilerParams(
            dimension_semantics=("parallel", "arbitrary"),
            vmem_limit_bytes=vmem_limit),
        cost_estimate=cost,
    )(x2d, w1, b1v, w2, b2v)

    return out2d.reshape(*orig_lead, d_out)


# --------------------------- parameter init / ref ----------------------------

def _lin_init(key, din, dout):
    # PyTorch nn.Linear-style init (uniform +/- 1/sqrt(fan_in)); weights stored
    # as (in, out) so the kernel computes x @ W directly.
    k1, k2 = jax.random.split(key)
    bound = 1.0 / math.sqrt(din)
    w = jax.random.uniform(k1, (din, dout), jnp.float32, -bound, bound)
    b = jax.random.uniform(k2, (dout,), jnp.float32, -bound, bound)
    return w, b


def _reference(x, w1, b1, w2, b2):
    # dropout = identity in eval mode.
    h = jnp.maximum(jnp.dot(x, w1, precision="highest") + b1, 0.0)
    return jnp.dot(h, w2, precision="highest") + b2


# ----------------------------------- main -------------------------------------

if __name__ == "__main__":
    key = jax.random.PRNGKey(0)

    # ---- test 1: module-sized small case (single tile) ----
    B, S, D_MODEL, D_FF = 2, 8, 32, 64
    kx, k1, k2, key = jax.random.split(key, 4)
    x = jax.random.normal(kx, (B, S, D_MODEL), jnp.float32)
    w1, b1 = _lin_init(k1, D_MODEL, D_FF)
    w2, b2 = _lin_init(k2, D_FF, D_MODEL)

    fwd = jax.jit(positionwise_feed_forward)
    out = jax.block_until_ready(fwd(x, w1, b1, w2, b2))
    ref = _reference(x, w1, b1, w2, b2)
    assert out.shape == (B, S, D_MODEL), out.shape
    assert bool(jnp.all(jnp.isfinite(out)))
    err = float(jnp.max(jnp.abs(out - ref)))
    assert bool(jnp.allclose(out, ref, rtol=1e-3, atol=1e-3)), err

    # ---- test 2: ragged row count + multi-step d_ff reduction + multi M tiles ----
    B2, S2, DM2, DF2 = 2, 13, 128, 512          # M = 26 (ragged vs tm=16)
    kx2, k3, k4, key = jax.random.split(key, 4)
    x2 = jax.random.normal(kx2, (B2, S2, DM2), jnp.float32)
    w1b, b1b = _lin_init(k3, DM2, DF2)
    w2b, b2b = _lin_init(k4, DF2, DM2)

    fwd2 = jax.jit(functools.partial(positionwise_feed_forward,
                                     block_m=16, block_f=256))
    out2 = jax.block_until_ready(fwd2(x2, w1b, b1b, w2b, b2b))
    ref2 = _reference(x2, w1b, b1b, w2b, b2b)
    assert out2.shape == (B2, S2, DM2), out2.shape
    assert bool(jnp.all(jnp.isfinite(out2)))
    err2 = float(jnp.max(jnp.abs(out2 - ref2)))
    assert bool(jnp.allclose(out2, ref2, rtol=1e-3, atol=1e-3)), err2

    print("KERNEL_OK")
</pallas_src>

<mosaic_0001>
module attributes {stable_mosaic.version = 11 : i64} {
  func.func @ffn_kernel(%arg0: i32, %arg1: i32, %arg2: memref<16x32xf32, #tpu.memory_space<vmem>>, %arg3: memref<32x64xf32, #tpu.memory_space<vmem>>, %arg4: memref<1x64xf32, #tpu.memory_space<vmem>>, %arg5: memref<64x32xf32, #tpu.memory_space<vmem>>, %arg6: memref<1x32xf32, #tpu.memory_space<vmem>>, %arg7: memref<16x32xf32, #tpu.memory_space<vmem>>, %arg8: memref<16x32xf32, #tpu.memory_space<vmem>>) attributes {dimension_semantics = [#tpu.dimension_semantics<parallel>, #tpu.dimension_semantics<arbitrary>], iteration_bounds = array<i64: 1, 1>, scalar_prefetch = 0 : i64, scratch_operands = 1 : i64, tpu.core_type = #tpu.core_type<tc>, window_params = [{transform_indices = @transform_0, window_bounds = array<i64: 16, 32>}, {transform_indices = @transform_1, window_bounds = array<i64: 32, 64>}, {transform_indices = @transform_2, window_bounds = array<i64: 1, 64>}, {transform_indices = @transform_3, window_bounds = array<i64: 64, 32>}, {pipeline_mode = #tpu.pipeline_mode<synchronous>, transform_indices = @transform_4, window_bounds = array<i64: 1, 32>}, {transform_indices = @transform_5, window_bounds = array<i64: 16, 32>}]} {
    %c0_i32 = arith.constant 0 : i32
    %0 = arith.cmpi eq, %arg1, %c0_i32 : i32
    %1 = arith.extui %0 : i1 to i32
    %c0_i32_0 = arith.constant 0 : i32
    %2 = arith.cmpi ne, %1, %c0_i32_0 : i32
    scf.if %2 {
      %cst_16 = arith.constant 0.000000e+00 : f32
      %19 = vector.broadcast %cst_16 : f32 to vector<16x32xf32>
      %c0_17 = arith.constant 0 : index
      %c0_18 = arith.constant 0 : index
      %20 = vector.load %arg8[%c0_17, %c0_18] : memref<16x32xf32, #tpu.memory_space<vmem>>, vector<16x32xf32>
      tpu.vector_store %arg8[%c0_17, %c0_18], %19 {strides = array<i32>} : memref<16x32xf32, #tpu.memory_space<vmem>>, vector<16x32xf32>,
    } else {
    }
    %c0 = arith.constant 0 : index
    %c0_1 = arith.constant 0 : index
    %3 = vector.load %arg2[%c0, %c0_1] : memref<16x32xf32, #tpu.memory_space<vmem>>, vector<16x32xf32>
    %c0_2 = arith.constant 0 : index
    %c0_3 = arith.constant 0 : index
    %4 = vector.load %arg3[%c0_2, %c0_3] : memref<32x64xf32, #tpu.memory_space<vmem>>, vector<32x64xf32>
    %cst = arith.constant dense<0.000000e+00> : vector<16x64xf32>
    %5 = tpu.matmul %3, %4, %cst {dimension_numbers = #tpu.dot_dimension_numbers<[1], [0], [0], [1], [0, 0, 1, 1], [], []>} : vector<16x32xf32>, vector<32x64xf32>, vector<16x64xf32> -> vector<16x64xf32>
    %c0_4 = arith.constant 0 : index
    %c0_5 = arith.constant 0 : index
    %6 = vector.load %arg4[%c0_4, %c0_5] : memref<1x64xf32, #tpu.memory_space<vmem>>, vector<1x64xf32>
    %7 = vector.broadcast %6 : vector<1x64xf32> to vector<16x64xf32>
    %8 = arith.addf %5, %7 : vector<16x64xf32>
    %cst_6 = arith.constant 0.000000e+00 : f32
    %9 = vector.broadcast %cst_6 : f32 to vector<16x64xf32>
    %10 = arith.maximumf %8, %9 : vector<16x64xf32>
    %c0_7 = arith.constant 0 : index
    %c0_8 = arith.constant 0 : index
    %11 = vector.load %arg8[%c0_7, %c0_8] : memref<16x32xf32, #tpu.memory_space<vmem>>, vector<16x32xf32>
    %c0_9 = arith.constant 0 : index
    %c0_10 = arith.constant 0 : index
    %12 = vector.load %arg5[%c0_9, %c0_10] : memref<64x32xf32, #tpu.memory_space<vmem>>, vector<64x32xf32>
    %cst_11 = arith.constant dense<0.000000e+00> : vector<16x32xf32>
    %13 = tpu.matmul %10, %12, %cst_11 {dimension_numbers = #tpu.dot_dimension_numbers<[1], [0], [0], [1], [0, 0, 1, 1], [], []>} : vector<16x64xf32>, vector<64x32xf32>, vector<16x32xf32> -> vector<16x32xf32>
    %14 = arith.addf %11, %13 : vector<16x32xf32>
    %c0_12 = arith.constant 0 : index
    %c0_13 = arith.constant 0 : index
    %15 = vector.load %arg8[%c0_12, %c0_13] : memref<16x32xf32, #tpu.memory_space<vmem>>, vector<16x32xf32>
    tpu.vector_store %arg8[%c0_12, %c0_13], %14 {strides = array<i32>} : memref<16x32xf32, #tpu.memory_space<vmem>>, vector<16x32xf32>,
    %c0_i32_14 = arith.constant 0 : i32
    %16 = arith.cmpi eq, %arg1, %c0_i32_14 : i32
    %17 = arith.extui %16 : i1 to i32
    %c0_i32_15 = arith.constant 0 : i32
    %18 = arith.cmpi ne, %17, %c0_i32_15 : i32
    scf.if %18 {
      %c0_16 = arith.constant 0 : index
      %c0_17 = arith.constant 0 : index
      %19 = vector.load %arg8[%c0_16, %c0_17] : memref<16x32xf32, #tpu.memory_space<vmem>>, vector<16x32xf32>
      %c0_18 = arith.constant 0 : index
      %c0_19 = arith.constant 0 : index
      %20 = vector.load %arg6[%c0_18, %c0_19] : memref<1x32xf32, #tpu.memory_space<vmem>>, vector<1x32xf32>
      %21 = vector.broadcast %20 : vector<1x32xf32> to vector<16x32xf32>
      %22 = arith.addf %19, %21 : vector<16x32xf32>
      %c0_20 = arith.constant 0 : index
      %c0_21 = arith.constant 0 : index
      %23 = vector.load %arg7[%c0_20, %c0_21] : memref<16x32xf32, #tpu.memory_space<vmem>>, vector<16x32xf32>
      tpu.vector_store %arg7[%c0_20, %c0_21], %22 {strides = array<i32>} : memref<16x32xf32, #tpu.memory_space<vmem>>, vector<16x32xf32>,
    } else {
    }
    return
  }
  func.func @transform_0(%arg0: i32, %arg1: i32) -> (i32, i32) {
    %c0_i32 = arith.constant 0 : i32
    %c0_i32_0 = arith.constant 0 : i32
    return %arg0, %c0_i32 : i32, i32
  }
  func.func @transform_1(%arg0: i32, %arg1: i32) -> (i32, i32) {
    %c0_i32 = arith.constant 0 : i32
    %c0_i32_0 = arith.constant 0 : i32
    return %c0_i32, %arg1 : i32, i32
  }
  func.func @transform_2(%arg0: i32, %arg1: i32) -> (i32, i32) {
    %c0_i32 = arith.constant 0 : i32
    %c0_i32_0 = arith.constant 0 : i32
    return %c0_i32, %arg1 : i32, i32
  }
  func.func @transform_3(%arg0: i32, %arg1: i32) -> (i32, i32) {
    %c0_i32 = arith.constant 0 : i32
    %c0_i32_0 = arith.constant 0 : i32
    return %arg1, %c0_i32 : i32, i32
  }
  func.func @transform_4(%arg0: i32, %arg1: i32) -> (i32, i32) {
    %c0_i32 = arith.constant 0 : i32
    %c0_i32_0 = arith.constant 0 : i32
    %c0_i32_1 = arith.constant 0 : i32
    return %c0_i32, %c0_i32_0 : i32, i32
  }
  func.func @transform_5(%arg0: i32, %arg1: i32) -> (i32, i32) {
    %c0_i32 = arith.constant 0 : i32
    %c0_i32_0 = arith.constant 0 : i32
    return %arg0, %c0_i32 : i32, i32
  }
}

</mosaic_0001>

<bundles_post_ra>
// kernel: positionwise_feed_forward.1
= control target key start
LH: loop header
LB: loop body
LE: loop exit
PB: predicated region body
PF: predicated region fallthrough
CT: control target
= control target key end

     0   :  { %s286_s0 = inlined_call_operand.vmem [shape: f32[16,32], index: 0, kind: input, shape index: {}]   ;;  %s287_s1 = inlined_call_operand.vmem [shape: f32[32,64], index: 1, kind: input, shape index: {}]   ;;  %s288_s2 = inlined_call_operand.vmem [shape: f32[1,64], index: 2, kind: input, shape index: {}]   ;;  %s289_s3 = inlined_call_operand.vmem [shape: f32[64,32], index: 3, kind: input, shape index: {}]   ;;  %s290_s4 = inlined_call_operand.vmem [shape: f32[1,32], index: 4, kind: input, shape index: {}]   ;;  %s291_s5 = inlined_call_operand.hbm [shape: f32[16,32], index: 5, kind: output, shape index: {}]  }
   0x1   :  { %v33_v0 = vld [vmem:[%s287_s1 + $0x18] sm:$0xff]  ;;  %v32_v1 = vld [vmem:[%s287_s1 + $0x10] sm:$0xff]  ;;  %v31_v2 = vld [vmem:[%s287_s1 + $0x8] sm:$0xff] }
   0x2   :  { %149 = vmatpush.msra.mxu3 %v33_v0  ;;  %57 = vmatpush.msra.mxu0 %v33_v0  ;;  %v79_v3 = vld [vmem:[%s289_s3 + $0x38] sm:$0xff]  ;;  %v78_v4 = vld [vmem:[%s289_s3 + $0x30] sm:$0xff]  ;;  %v30_v5 = vld [vmem:[%s287_s1] sm:$0xff] }
   0x3   :  { %153 = vmatpush.msra.mxu2 %v79_v3  ;;  %95 = vmatpush.msra.mxu1 %v79_v3 }
   0x4   :  { %150 = vmatpush.msra.mxu3 %v32_v1  ;;  %58 = vmatpush.msra.mxu0 %v32_v1 }
   0x5   :  { %10 = vsyncpa [#allocation4], 0  ;;  %vm25_vm0 = vcmask 261120   ;;  %v29_v6 = vld [vmem:[%s286_s0 + $0x8] sm:$0xff]  ;;  %v28_v7 = vld [vmem:[%s286_s0] sm:$0xff]  ;;  %154 = vmatpush.msra.mxu2 %v78_v4  ;;  %96 = vmatpush.msra.mxu1 %v78_v4  ;;  %v193_v14 = vmov 0.0  }
   0x6   :  { %151 = vmatpush.msra.mxu3 %v31_v2  ;;  %59 = vmatpush.msra.mxu0 %v31_v2  ;;  %v77_v8 = vld [vmem:[%s289_s3 + $0x28] sm:$0xff]  ;;  %v76_v9 = vld [vmem:[%s289_s3 + $0x20] sm:$0xff]  ;;  %v75_v10 = vld [vmem:[%s289_s3 + $0x18] sm:$0xff]  ;;  %26 = vst.msk [vmem:[#allocation2] sm:$0xff] %vm25_vm0, %v193_v14  ;;  %vm80_vm1 = vcmask 523264   ;;  %s133_s25 = sshll.u32 %s291_s5, 4  ;;  %s134_s25 = int_to_ptr.hbm [resolvable:$true] %s133_s25 }
   0x7   :  { %155 = vmatpush.msra.mxu2 %v77_v8  ;;  %97 = vmatpush.msra.mxu1 %v77_v8  ;;  %v74_v11 = vld [vmem:[%s289_s3 + $0x10] sm:$0xff]  ;;  %v73_v12 = vld [vmem:[%s289_s3 + $0x8] sm:$0xff]  ;;  %v72_v13 = vld [vmem:[%s289_s3] sm:$0xff]  ;;  %27 = vst.msk [vmem:[#allocation2 + $0x8] sm:$0xff] %vm25_vm0, %v193_v14  ;;  %s196_s26 = smov 8  }
   0x8   :  { %152 = vmatpush.msra.mxu3 %v30_v5  ;;  %60 = vmatpush.msra.mxu0 %v30_v5  ;;  %v165_v15 = vld [vmem:[%s288_s2] ss:$0 sm:$0xff]  ;;  %s194_s2 = smov [#allocation3]  }
   0x9   :  { %146 = vmatmul.msk.f32.vlgmr.msra.gmra.mxu3 %vm25_vm0, %v29_v6  ;;  %145 = vmatmul.msk.f32.vlgmr.msra.gmra.mxu0 %vm25_vm0, %v28_v7  ;;  %v166_v25 = vld [vmem:[%s290_s4] ss:$0 sm:$0xff]  ;;  %s131_s22 = sshll.u32 %s194_s2, 4  ;;  %s195_s4 = smov 128   ;;  %s132_s22 = int_to_ptr.vmem [resolvable:$true] %s131_s22 }
   0xa   :  { %156 = vmatpush.msra.mxu2 %v76_v9  ;;  %98 = vmatpush.msra.mxu1 %v76_v9 }
   0xc   :  { %157 = vmatpush.msra.mxu2 %v75_v10  ;;  %99 = vmatpush.msra.mxu1 %v75_v10 }
   0xd   :  { %v70_v22 = vld [vmem:[#allocation2] sm:$0xff] }
   0xe   :  { %158 = vmatpush.msra.mxu2 %v74_v11  ;;  %100 = vmatpush.msra.mxu1 %v74_v11  ;;  %v71_v26 = vld [vmem:[#allocation2 + $0x8] sm:$0xff] }
  0x10   :  { %159 = vmatpush.msra.mxu2 %v73_v12  ;;  %101 = vmatpush.msra.mxu1 %v73_v12 }
  0x12   :  { %160 = vmatpush.msra.mxu2 %v72_v13  ;;  %102 = vmatpush.msra.mxu1 %v72_v13 }
  0x86   :  { %v62_v16 = vpop.f32.mrf.mxu0 }
  0x87   :  { %v63_v17 = vadd.f32 %v165_v15, %v62_v16 }
  0x89   :  { %v68_v18 = vmax.f32 %v63_v17, 0.0 }
  0x8b   :  { %147 = vmatmul.msk.f32.vlgmr.msra.gmra.mxu1 %vm80_vm1, %v68_v18 }
  0x8c   :  { %v65_v19 = vpop.f32.mrf.mxu3 }
  0x8d   :  { %v66_v20 = vadd.f32 %v165_v15, %v65_v19 }
  0x8f   :  { %v69_v21 = vmax.f32 %v66_v20, 0.0 }
  0x91   :  { %148 = vmatmul.msk.f32.vlgmr.msra.gmra.mxu2 %vm80_vm1, %v69_v21 }
 0x108   :  { %v104_v23 = vpop.f32.mrf.mxu1 }
 0x109   :  { %v110_v24 = vadd.f32 %v104_v23, %v70_v22 }
 0x10b   :  { %112 = vst.msk [vmem:[#allocation2] sm:$0xff] %vm25_vm0, %v110_v24 }
 0x112   :  { %v117_v27 = vld [vmem:[#allocation2] sm:$0xff] }
 0x113   :  { %v123_v28 = vadd.f32 %v166_v25, %v117_v27 }
 0x114   :  { %v107_v29 = vpop.f32.mrf.mxu2 }
 0x115   :  { %v111_v30 = vadd.f32 %v107_v29, %v71_v26  ;;  %125 = vst.msk [vmem:[#allocation3] sm:$0xff] %vm25_vm0, %v123_v28 }
 0x117   :  { %113 = vst.msk [vmem:[#allocation2 + $0x8] sm:$0xff] %vm25_vm0, %v111_v30 }
 0x11e   :  { %v118_v31 = vld [vmem:[#allocation2 + $0x8] sm:$0xff] }
 0x11f   :  { %v124_v32 = vadd.f32 %v166_v25, %v118_v31 }
 0x121   :  { %126 = vst.msk [vmem:[#allocation3 + $0x8] sm:$0xff] %vm25_vm0, %v124_v32 }
 0x122   :  { %139 = dma.vmem_to_hbm [thread:$0]  %s132_s22, 256, %s134_s25, [#allocation4], %s195_s4, %s195_s4, %s196_s26  }
 0x123   :  { %191 = dma.done.wait [#allocation4], 256  }
 0x124   :  { %192 = vsyncadd [#allocation4], 4294967040 }
 0x125   :  { %144 = vsyncpa [#allocation4], 1 }

</bundles_post_ra>
